<compile_context>
chip_gen: v6e
topology: v6e:2x2x1
jax: 0.10.0
libtpu: 0.0.40
codegen_flags: <defaults>
</compile_context>

<pallas_src>
import numpy as np

import jax
import jax.numpy as jnp
from jax.experimental import pallas as pl
from jax.experimental.pallas import tpu as pltpu


_DEFAULT_MEAN = (0.0, 0.0, 0.0, 0.0)
_DEFAULT_STD = (0.1, 0.1, 0.2, 0.2)


def _make_bbox_kernel(mean, std):
    """Build a kernel with mean/std baked in as compile-time scalars."""
    m = tuple(float(v) for v in np.asarray(mean, dtype=np.float32))
    s = tuple(float(v) for v in np.asarray(std, dtype=np.float32))

    def kernel(boxes_ref, deltas_ref, out_ref):
        # boxes_ref / deltas_ref / out_ref: (4, TR, L) f32 VMEM tiles.
        # Each [c] slice is a dense (TR, L) plane.
        x1 = boxes_ref[0]
        y1 = boxes_ref[1]
        x2 = boxes_ref[2]
        y2 = boxes_ref[3]

        w = x2 - x1
        h = y2 - y1
        ctr_x = x1 + 0.5 * w
        ctr_y = y1 + 0.5 * h

        dx = deltas_ref[0] * s[0] + m[0]
        dy = deltas_ref[1] * s[1] + m[1]
        dw = deltas_ref[2] * s[2] + m[2]
        dh = deltas_ref[3] * s[3] + m[3]

        pred_ctr_x = ctr_x + dx * w
        pred_ctr_y = ctr_y + dy * h
        half_w = 0.5 * (jnp.exp(dw) * w)   # exp -> EUP (free slot)
        half_h = 0.5 * (jnp.exp(dh) * h)

        # Direct per-plane stores: no concat, no extra VMEM temporary.
        out_ref[0] = pred_ctr_x - half_w
        out_ref[1] = pred_ctr_y - half_h
        out_ref[2] = pred_ctr_x + half_w
        out_ref[3] = pred_ctr_y + half_h

    return kernel


def bbox_transform(boxes, deltas, mean=None, std=None, *, lanes=512, tile_rows=128):
    """boxes, deltas: (B, N, 4) -> pred_boxes (B, N, 4) float32."""
    if mean is None:
        mean = _DEFAULT_MEAN
    if std is None:
        std = _DEFAULT_STD

    B, N, C = boxes.shape
    assert C == 4 and deltas.shape == boxes.shape
    M = B * N

    # Glue: (B, N, 4) -> planar (4, B*N). Batch is folded into N so the grid
    # is one long "parallel" axis.
    # TODO(synk): these two transposes (and the inverse at the end) are a full
    # HBM pass each; they disappear only if producer/consumer adopt the planar
    # (4, N) layout upstream.
    boxes_p = jnp.transpose(boxes.reshape(M, 4).astype(jnp.float32))    # (4, M)
    deltas_p = jnp.transpose(deltas.reshape(M, 4).astype(jnp.float32))  # (4, M)

    # Tile geometry: present the M axis as (rows, lanes) so each coordinate
    # plane inside the kernel is a dense (tile_rows, lanes) slab.
    r_needed = -(-M // lanes)                                  # ceil(M / lanes)
    tr = max(8, min(tile_rows, ((r_needed + 7) // 8) * 8))     # shrink for tiny M
    tr = (tr // 8) * 8                                         # multiple of 8
    Rp = ((r_needed + tr - 1) // tr) * tr                      # rows, padded
    Mp = Rp * lanes

    if Mp != M:
        pad = ((0, 0), (0, Mp - M))
        boxes_p = jnp.pad(boxes_p, pad)
        deltas_p = jnp.pad(deltas_p, pad)

    boxes_3d = boxes_p.reshape(4, Rp, lanes)
    deltas_3d = deltas_p.reshape(4, Rp, lanes)

    grid = (Rp // tr,)
    spec = pl.BlockSpec((4, tr, lanes), lambda i: (0, i, 0))

    out_3d = pl.pallas_call(
        _make_bbox_kernel(mean, std),
        out_shape=jax.ShapeDtypeStruct((4, Rp, lanes), jnp.float32),
        grid=grid,
        in_specs=[spec, spec],
        out_specs=spec,
        compiler_params=pltpu.CompilerParams(
            dimension_semantics=("parallel",)
        ),
    )(boxes_3d, deltas_3d)

    out = jnp.transpose(out_3d.reshape(4, Mp)[:, :M]).reshape(B, N, 4)
    return out


def _bbox_transform_ref(boxes, deltas, mean, std):
    widths = boxes[:, :, 2] - boxes[:, :, 0]
    heights = boxes[:, :, 3] - boxes[:, :, 1]
    ctr_x = boxes[:, :, 0] + 0.5 * widths
    ctr_y = boxes[:, :, 1] + 0.5 * heights
    dx = deltas[:, :, 0] * std[0] + mean[0]
    dy = deltas[:, :, 1] * std[1] + mean[1]
    dw = deltas[:, :, 2] * std[2] + mean[2]
    dh = deltas[:, :, 3] * std[3] + mean[3]
    pred_ctr_x = ctr_x + dx * widths
    pred_ctr_y = ctr_y + dy * heights
    pred_w = jnp.exp(dw) * widths
    pred_h = jnp.exp(dh) * heights
    return jnp.stack(
        [
            pred_ctr_x - 0.5 * pred_w,
            pred_ctr_y - 0.5 * pred_h,
            pred_ctr_x + 0.5 * pred_w,
            pred_ctr_y + 0.5 * pred_h,
        ],
        axis=2,
    )


if __name__ == "__main__":
    key = jax.random.PRNGKey(0)
    k1, k2, k3 = jax.random.split(key, 3)

    mean = jnp.asarray(_DEFAULT_MEAN, dtype=jnp.float32)
    std = jnp.asarray(_DEFAULT_STD, dtype=jnp.float32)

    # Primary small case: (batch=2, anchors=256).
    B, N = 2, 256
    xy = jax.random.uniform(k1, (B, N, 2), dtype=jnp.float32) * 100.0
    wh = jax.random.uniform(k2, (B, N, 2), dtype=jnp.float32) * 50.0 + 1.0
    boxes = jnp.concatenate([xy, xy + wh], axis=-1)
    deltas = jax.random.normal(k3, (B, N, 4), dtype=jnp.float32)

    out = jax.block_until_ready(bbox_transform(boxes, deltas))
    ref = _bbox_transform_ref(boxes, deltas, mean, std)
    assert out.shape == (B, N, 4)
    assert jnp.allclose(out, ref, atol=1e-4, rtol=1e-4)

    # Secondary ragged case to exercise the padding path (B*N not lane-aligned).
    B2, N2 = 3, 200
    k4, k5, k6 = jax.random.split(jax.random.PRNGKey(1), 3)
    xy2 = jax.random.uniform(k4, (B2, N2, 2), dtype=jnp.float32) * 64.0
    wh2 = jax.random.uniform(k5, (B2, N2, 2), dtype=jnp.float32) * 32.0 + 1.0
    boxes2 = jnp.concatenate([xy2, xy2 + wh2], axis=-1)
    deltas2 = jax.random.normal(k6, (B2, N2, 4), dtype=jnp.float32)

    out2 = jax.block_until_ready(bbox_transform(boxes2, deltas2))
    ref2 = _bbox_transform_ref(boxes2, deltas2, mean, std)
    assert out2.shape == (B2, N2, 4)
    assert jnp.allclose(out2, ref2, atol=1e-4, rtol=1e-4)

    print("KERNEL_OK")
</pallas_src>

<mosaic_0001>
module attributes {stable_mosaic.version = 11 : i64} {
  func.func @kernel(%arg0: i32, %arg1: memref<4x8x512xf32, #tpu.memory_space<vmem>>, %arg2: memref<4x8x512xf32, #tpu.memory_space<vmem>>, %arg3: memref<4x8x512xf32, #tpu.memory_space<vmem>>) attributes {dimension_semantics = [#tpu.dimension_semantics<parallel>], iteration_bounds = array<i64: 1>, scalar_prefetch = 0 : i64, scratch_operands = 0 : i64, tpu.core_type = #tpu.core_type<tc>, window_params = [{transform_indices = @transform_0, window_bounds = array<i64: 4, 8, 512>}, {transform_indices = @transform_1, window_bounds = array<i64: 4, 8, 512>}, {transform_indices = @transform_2, window_bounds = array<i64: 4, 8, 512>}]} {
    %c0 = arith.constant 0 : index
    %c0_0 = arith.constant 0 : index
    %c0_1 = arith.constant 0 : index
    %0 = vector.load %arg1[%c0, %c0_0, %c0_1] : memref<4x8x512xf32, #tpu.memory_space<vmem>>, vector<1x8x512xf32>
    %1 = vector.shape_cast %0 : vector<1x8x512xf32> to vector<8x512xf32>
    %c1 = arith.constant 1 : index
    %c0_2 = arith.constant 0 : index
    %c0_3 = arith.constant 0 : index
    %2 = vector.load %arg1[%c1, %c0_2, %c0_3] : memref<4x8x512xf32, #tpu.memory_space<vmem>>, vector<1x8x512xf32>
    %3 = vector.shape_cast %2 : vector<1x8x512xf32> to vector<8x512xf32>
    %c2 = arith.constant 2 : index
    %c0_4 = arith.constant 0 : index
    %c0_5 = arith.constant 0 : index
    %4 = vector.load %arg1[%c2, %c0_4, %c0_5] : memref<4x8x512xf32, #tpu.memory_space<vmem>>, vector<1x8x512xf32>
    %5 = vector.shape_cast %4 : vector<1x8x512xf32> to vector<8x512xf32>
    %c3 = arith.constant 3 : index
    %c0_6 = arith.constant 0 : index
    %c0_7 = arith.constant 0 : index
    %6 = vector.load %arg1[%c3, %c0_6, %c0_7] : memref<4x8x512xf32, #tpu.memory_space<vmem>>, vector<1x8x512xf32>
    %7 = vector.shape_cast %6 : vector<1x8x512xf32> to vector<8x512xf32>
    %8 = arith.subf %5, %1 : vector<8x512xf32>
    %9 = arith.subf %7, %3 : vector<8x512xf32>
    %cst = arith.constant 5.000000e-01 : f32
    %10 = vector.broadcast %cst : f32 to vector<8x512xf32>
    %11 = arith.mulf %10, %8 : vector<8x512xf32>
    %12 = arith.addf %1, %11 : vector<8x512xf32>
    %cst_8 = arith.constant 5.000000e-01 : f32
    %13 = vector.broadcast %cst_8 : f32 to vector<8x512xf32>
    %14 = arith.mulf %13, %9 : vector<8x512xf32>
    %15 = arith.addf %3, %14 : vector<8x512xf32>
    %c0_9 = arith.constant 0 : index
    %c0_10 = arith.constant 0 : index
    %c0_11 = arith.constant 0 : index
    %16 = vector.load %arg2[%c0_9, %c0_10, %c0_11] : memref<4x8x512xf32, #tpu.memory_space<vmem>>, vector<1x8x512xf32>
    %17 = vector.shape_cast %16 : vector<1x8x512xf32> to vector<8x512xf32>
    %cst_12 = arith.constant 1.000000e-01 : f32
    %18 = vector.broadcast %cst_12 : f32 to vector<8x512xf32>
    %19 = arith.mulf %17, %18 : vector<8x512xf32>
    %cst_13 = arith.constant 0.000000e+00 : f32
    %20 = vector.broadcast %cst_13 : f32 to vector<8x512xf32>
    %21 = arith.addf %19, %20 : vector<8x512xf32>
    %c1_14 = arith.constant 1 : index
    %c0_15 = arith.constant 0 : index
    %c0_16 = arith.constant 0 : index
    %22 = vector.load %arg2[%c1_14, %c0_15, %c0_16] : memref<4x8x512xf32, #tpu.memory_space<vmem>>, vector<1x8x512xf32>
    %23 = vector.shape_cast %22 : vector<1x8x512xf32> to vector<8x512xf32>
    %cst_17 = arith.constant 1.000000e-01 : f32
    %24 = vector.broadcast %cst_17 : f32 to vector<8x512xf32>
    %25 = arith.mulf %23, %24 : vector<8x512xf32>
    %cst_18 = arith.constant 0.000000e+00 : f32
    %26 = vector.broadcast %cst_18 : f32 to vector<8x512xf32>
    %27 = arith.addf %25, %26 : vector<8x512xf32>
    %c2_19 = arith.constant 2 : index
    %c0_20 = arith.constant 0 : index
    %c0_21 = arith.constant 0 : index
    %28 = vector.load %arg2[%c2_19, %c0_20, %c0_21] : memref<4x8x512xf32, #tpu.memory_space<vmem>>, vector<1x8x512xf32>
    %29 = vector.shape_cast %28 : vector<1x8x512xf32> to vector<8x512xf32>
    %cst_22 = arith.constant 2.000000e-01 : f32
    %30 = vector.broadcast %cst_22 : f32 to vector<8x512xf32>
    %31 = arith.mulf %29, %30 : vector<8x512xf32>
    %cst_23 = arith.constant 0.000000e+00 : f32
    %32 = vector.broadcast %cst_23 : f32 to vector<8x512xf32>
    %33 = arith.addf %31, %32 : vector<8x512xf32>
    %c3_24 = arith.constant 3 : index
    %c0_25 = arith.constant 0 : index
    %c0_26 = arith.constant 0 : index
    %34 = vector.load %arg2[%c3_24, %c0_25, %c0_26] : memref<4x8x512xf32, #tpu.memory_space<vmem>>, vector<1x8x512xf32>
    %35 = vector.shape_cast %34 : vector<1x8x512xf32> to vector<8x512xf32>
    %cst_27 = arith.constant 2.000000e-01 : f32
    %36 = vector.broadcast %cst_27 : f32 to vector<8x512xf32>
    %37 = arith.mulf %35, %36 : vector<8x512xf32>
    %cst_28 = arith.constant 0.000000e+00 : f32
    %38 = vector.broadcast %cst_28 : f32 to vector<8x512xf32>
    %39 = arith.addf %37, %38 : vector<8x512xf32>
    %40 = arith.mulf %21, %8 : vector<8x512xf32>
    %41 = arith.addf %12, %40 : vector<8x512xf32>
    %42 = arith.mulf %27, %9 : vector<8x512xf32>
    %43 = arith.addf %15, %42 : vector<8x512xf32>
    %44 = math.exp %33 : vector<8x512xf32>
    %45 = arith.mulf %44, %8 : vector<8x512xf32>
    %cst_29 = arith.constant 5.000000e-01 : f32
    %46 = vector.broadcast %cst_29 : f32 to vector<8x512xf32>
    %47 = arith.mulf %46, %45 : vector<8x512xf32>
    %48 = math.exp %39 : vector<8x512xf32>
    %49 = arith.mulf %48, %9 : vector<8x512xf32>
    %cst_30 = arith.constant 5.000000e-01 : f32
    %50 = vector.broadcast %cst_30 : f32 to vector<8x512xf32>
    %51 = arith.mulf %50, %49 : vector<8x512xf32>
    %52 = arith.subf %41, %47 : vector<8x512xf32>
    %c0_31 = arith.constant 0 : index
    %c0_32 = arith.constant 0 : index
    %c0_33 = arith.constant 0 : index
    %53 = vector.load %arg3[%c0_31, %c0_32, %c0_33] : memref<4x8x512xf32, #tpu.memory_space<vmem>>, vector<1x8x512xf32>
    %54 = vector.shape_cast %53 : vector<1x8x512xf32> to vector<8x512xf32>
    %55 = vector.shape_cast %52 : vector<8x512xf32> to vector<1x8x512xf32>
    tpu.vector_store %arg3[%c0_31, %c0_32, %c0_33], %55 {strides = array<i32>} : memref<4x8x512xf32, #tpu.memory_space<vmem>>, vector<1x8x512xf32>,
    %56 = arith.subf %43, %51 : vector<8x512xf32>
    %c1_34 = arith.constant 1 : index
    %c0_35 = arith.constant 0 : index
    %c0_36 = arith.constant 0 : index
    %57 = vector.load %arg3[%c1_34, %c0_35, %c0_36] : memref<4x8x512xf32, #tpu.memory_space<vmem>>, vector<1x8x512xf32>
    %58 = vector.shape_cast %57 : vector<1x8x512xf32> to vector<8x512xf32>
    %59 = vector.shape_cast %56 : vector<8x512xf32> to vector<1x8x512xf32>
    tpu.vector_store %arg3[%c1_34, %c0_35, %c0_36], %59 {strides = array<i32>} : memref<4x8x512xf32, #tpu.memory_space<vmem>>, vector<1x8x512xf32>,
    %60 = arith.addf %41, %47 : vector<8x512xf32>
    %c2_37 = arith.constant 2 : index
    %c0_38 = arith.constant 0 : index
    %c0_39 = arith.constant 0 : index
    %61 = vector.load %arg3[%c2_37, %c0_38, %c0_39] : memref<4x8x512xf32, #tpu.memory_space<vmem>>, vector<1x8x512xf32>
    %62 = vector.shape_cast %61 : vector<1x8x512xf32> to vector<8x512xf32>
    %63 = vector.shape_cast %60 : vector<8x512xf32> to vector<1x8x512xf32>
    tpu.vector_store %arg3[%c2_37, %c0_38, %c0_39], %63 {strides = array<i32>} : memref<4x8x512xf32, #tpu.memory_space<vmem>>, vector<1x8x512xf32>,
    %64 = arith.addf %43, %51 : vector<8x512xf32>
    %c3_40 = arith.constant 3 : index
    %c0_41 = arith.constant 0 : index
    %c0_42 = arith.constant 0 : index
    %65 = vector.load %arg3[%c3_40, %c0_41, %c0_42] : memref<4x8x512xf32, #tpu.memory_space<vmem>>, vector<1x8x512xf32>
    %66 = vector.shape_cast %65 : vector<1x8x512xf32> to vector<8x512xf32>
    %67 = vector.shape_cast %64 : vector<8x512xf32> to vector<1x8x512xf32>
    tpu.vector_store %arg3[%c3_40, %c0_41, %c0_42], %67 {strides = array<i32>} : memref<4x8x512xf32, #tpu.memory_space<vmem>>, vector<1x8x512xf32>,
    return
  }
  func.func @transform_0(%arg0: i32) -> (i32, i32, i32) {
    %c0_i32 = arith.constant 0 : i32
    %c0_i32_0 = arith.constant 0 : i32
    %c0_i32_1 = arith.constant 0 : i32
    return %c0_i32, %arg0, %c0_i32_0 : i32, i32, i32
  }
  func.func @transform_1(%arg0: i32) -> (i32, i32, i32) {
    %c0_i32 = arith.constant 0 : i32
    %c0_i32_0 = arith.constant 0 : i32
    %c0_i32_1 = arith.constant 0 : i32
    return %c0_i32, %arg0, %c0_i32_0 : i32, i32, i32
  }
  func.func @transform_2(%arg0: i32) -> (i32, i32, i32) {
    %c0_i32 = arith.constant 0 : i32
    %c0_i32_0 = arith.constant 0 : i32
    %c0_i32_1 = arith.constant 0 : i32
    return %c0_i32, %arg0, %c0_i32_0 : i32, i32, i32
  }
}

</mosaic_0001>

<bundles_post_ra>
// kernel: tpu_custom_call.1
= control target key start
LH: loop header
LB: loop body
LE: loop exit
PB: predicated region body
PF: predicated region fallthrough
CT: control target
= control target key end

     0   :  { %7 = vsyncpa [#allocation3], 0  ;;  %s380_s0 = inlined_call_operand.hbm [shape: f32[4,8,512], index: 0, kind: input, shape index: {}]   ;;  %s381_s1 = inlined_call_operand.hbm [shape: f32[4,8,512], index: 1, kind: input, shape index: {}]   ;;  %s382_s2 = inlined_call_operand.hbm [shape: f32[4,8,512], index: 2, kind: output, shape index: {}]  }
   0x1   :  { %8 = vsyncpa [#allocation6], 0 }
   0x2   :  { %9 = vsyncpa [#allocation4], 0  ;;  %s322_s9 = smov [#allocation2]  }
   0x3   :  { %s15_s10 = sshll.u32 %s322_s9, 4  ;;  %s16_s10 = int_to_ptr.vmem [resolvable:$true] %s15_s10 }
   0x4   :  { %s264_s11 = scalar_lea.vmem %s16_s10, 2048  ;;  %p269_p1 = scmp.lt.s32.totalorder %s16_s10, %s16_s10 }
   0x5   :  { %p265_p0 = scmp.ne.s32.totalorder %s16_s10, %s264_s11  ;;  %p270_p2 = scmp.lt.s32.totalorder %s264_s11, %s264_s11 }
   0x7   :  { %p271_p3 = por %p270_p2, %p269_p1 }
   0x9   :  { %p272_p4 = pnand %p271_p3, %p265_p0 }
   0xb   :  { %275 = shalt.err (!%p272_p4)
}
   0xc   :  { %s323_s12 = smov 512   ;;  %s324_s13 = smov 32  }
   0xd   :  { %21 = dma.hbm_to_vmem [thread:$0]  %s380_s0, 2048, %s16_s10, [#allocation3], %s323_s12, %s323_s12, %s324_s13  }
   0xe   :  { %s325_s16 = smov [#allocation5]  }
   0xf   :  { %s27_s17 = sshll.u32 %s325_s16, 4  ;;  %s28_s17 = int_to_ptr.vmem [resolvable:$true] %s27_s17 }
  0x10   :  { %s284_s18 = scalar_lea.vmem %s28_s17, 2048  ;;  %p289_p6 = scmp.lt.s32.totalorder %s28_s17, %s28_s17 }
  0x11   :  { %p285_p5 = scmp.ne.s32.totalorder %s28_s17, %s284_s18  ;;  %p290_p7 = scmp.lt.s32.totalorder %s284_s18, %s284_s18 }
  0x13   :  { %p291_p8 = por %p290_p7, %p289_p6 }
  0x15   :  { %p292_p9 = pnand %p291_p8, %p285_p5 }
  0x17   :  { %295 = shalt.err (!%p292_p9)
}
  0x18   :  { %33 = dma.hbm_to_vmem [thread:$0]  %s381_s1, 2048, %s28_s17, [#allocation6], %s323_s12, %s323_s12, %s324_s13  }
  0x19   :  { %316 = dma.done.wait [#allocation3], 2048  }
  0x1a   :  { %317 = vsyncadd [#allocation3], 4294965248 }
  0x1b   :  { %318 = dma.done.wait [#allocation6], 2048  }
  0x1c   :  { %319 = vsyncadd [#allocation6], 4294965248  ;;  %v109_v0 = vld [vmem:[#allocation5 + $0x40] sm:$0xff]  ;;  %v110_v2 = vld [vmem:[#allocation5 + $0x48] sm:$0xff]  ;;  %s326_s0 = smov [#allocation7]  }
  0x1d   :  { %v113_v1 = vmul.f32 0.2, %v109_v0  ;;  %v40_v3 = vld [vmem:[#allocation2] sm:$0xff]  ;;  %v114_v5 = vmul.f32 0.2, %v110_v2  ;;  %v41_v7 = vld [vmem:[#allocation2 + $0x8] sm:$0xff] }
  0x1e   :  { %v50_v4 = vld [vmem:[#allocation2 + $0x40] sm:$0xff]  ;;  %v51_v8 = vld [vmem:[#allocation2 + $0x48] sm:$0xff]  ;;  %v111_v9 = vld [vmem:[#allocation5 + $0x50] sm:$0xff]  ;;  %s222_s1 = sshll.u32 %s326_s0, 4  ;;  %s223_s1 = int_to_ptr.vmem [resolvable:$true] %s222_s1 }
  0x1f   :  { %v150_v6 = vmul.f32 1.442695, %v113_v1  ;;  %v152_v10 = vmul.f32 1.442695, %v114_v5  ;;  %v354_v11 = vsub.f32 %v50_v4, %v40_v3  ;;  %v42_v12 = vld [vmem:[#allocation2 + $0x10] sm:$0xff]  ;;  %v112_v15 = vld [vmem:[#allocation5 + $0x58] sm:$0xff]  ;;  %v60_v17 = vsub.f32 %v51_v8, %v41_v7  ;;  %p301_p11 = scmp.lt.s32.totalorder %s223_s1, %s223_s1 }
  0x20   :  { %v52_v13 = vld [vmem:[#allocation2 + $0x50] sm:$0xff]  ;;  %v115_v14 = vmul.f32 0.2, %v111_v9  ;;  %v83_v16 = vld [vmem:[#allocation5] sm:$0xff]  ;;  %v84_v19 = vld [vmem:[#allocation5 + $0x8] sm:$0xff]  ;;  %s296_s21 = scalar_lea.vmem %s223_s1, 2048 }
  0x21   :  { %240 = vpow2.f32 %v150_v6  ;;  %v122_v18 = vld [vmem:[#allocation5 + $0x60] sm:$0xff]  ;;  %v356_v21 = vsub.f32 %v52_v13, %v42_v12  ;;  %v116_v22 = vmul.f32 0.2, %v112_v15  ;;  %v123_v23 = vld [vmem:[#allocation5 + $0x68] sm:$0xff]  ;;  %v67_v24 = vmul.f32 0.5, %v354_v11  ;;  %v85_v26 = vld [vmem:[#allocation5 + $0x10] sm:$0xff]  ;;  %p297_p10 = scmp.ne.s32.totalorder %s223_s1, %s296_s21  ;;  %p302_p12 = scmp.lt.s32.totalorder %s296_s21, %s296_s21 }
  0x22   :  { %242 = vpow2.f32 %v152_v10  ;;  %v154_v20 = vmul.f32 1.442695, %v115_v14  ;;  %v87_v25 = vmul.f32 0.1, %v83_v16  ;;  %v126_v27 = vmul.f32 0.2, %v122_v18 }
  0x23   :  { %v68_v28 = vmul.f32 0.5, %v60_v17  ;;  %v88_v29 = vmul.f32 0.1, %v84_v19  ;;  %v43_v30 = vld [vmem:[#allocation2 + $0x18] sm:$0xff]  ;;  %v156_v31 = vmul.f32 1.442695, %v116_v22  ;;  %v71_v42 = vadd.f32 %v67_v24, %v40_v3  ;;  %p303_p13 = por %p302_p12, %p301_p11 }
  0x24   :  { %244 = vpow2.f32 %v154_v20  ;;  %v53_v32 = vld [vmem:[#allocation2 + $0x58] sm:$0xff]  ;;  %v166_v33 = vmul.f32 1.442695, %v126_v27  ;;  %v127_v34 = vmul.f32 0.2, %v123_v23  ;;  %v124_v35 = vld [vmem:[#allocation5 + $0x70] sm:$0xff]  ;;  %v134_v43 = vmul.f32 %v87_v25, %v354_v11 }
  0x25   :  { %v69_v36 = vmul.f32 0.5, %v356_v21  ;;  %v89_v37 = vmul.f32 0.1, %v85_v26  ;;  %246 = vpow2.f32 %v156_v31  ;;  %v45_v38 = vld [vmem:[#allocation2 + $0x20] sm:$0xff]  ;;  %v125_v41 = vld [vmem:[#allocation5 + $0x78] sm:$0xff]  ;;  %v361_v44 = vsub.f32 %v53_v32, %v43_v30  ;;  %v46_v46 = vld [vmem:[#allocation2 + $0x28] sm:$0xff]  ;;  %p304_p0 = pnand %p303_p13, %p297_p10 }
  0x26   :  { %v55_v39 = vld [vmem:[#allocation2 + $0x60] sm:$0xff]  ;;  %248 = vpow2.f32 %v166_v33  ;;  %v168_v40 = vmul.f32 1.442695, %v127_v34  ;;  %v86_v45 = vld [vmem:[#allocation5 + $0x18] sm:$0xff]  ;;  %v56_v47 = vld [vmem:[#allocation2 + $0x68] sm:$0xff]  ;;  %v72_v49 = vadd.f32 %v68_v28, %v41_v7  ;;  %v135_v50 = vmul.f32 %v88_v29, %v60_v17 }
  0x27   :  { %v128_v48 = vmul.f32 0.2, %v124_v35  ;;  %v63_v51 = vsub.f32 %v55_v39, %v45_v38  ;;  %v96_v52 = vld [vmem:[#allocation5 + $0x20] sm:$0xff]  ;;  %v73_v53 = vadd.f32 %v69_v36, %v42_v12  ;;  %v136_v54 = vmul.f32 %v89_v37, %v356_v21  ;;  %v47_v59 = vld [vmem:[#allocation2 + $0x30] sm:$0xff]  ;;  %v97_v0 = vld [vmem:[#allocation5 + $0x28] sm:$0xff] }
  0x28   :  { %250 = vpow2.f32 %v168_v40  ;;  %v129_v56 = vmul.f32 0.2, %v125_v41  ;;  %v90_v57 = vmul.f32 0.1, %v86_v45  ;;  %v364_v58 = vsub.f32 %v56_v47, %v46_v46  ;;  %v57_v60 = vld [vmem:[#allocation2 + $0x70] sm:$0xff]  ;;  %v48_v7 = vld [vmem:[#allocation2 + $0x38] sm:$0xff] }
  0x29   :  { %v170_v55 = vmul.f32 1.442695, %v128_v48  ;;  %v70_v62 = vmul.f32 0.5, %v361_v44  ;;  %v100_v63 = vmul.f32 0.1, %v96_v52  ;;  %v138_v3 = vadd.f32 %v134_v43, %v71_v42  ;;  %v58_v8 = vld [vmem:[#allocation2 + $0x78] sm:$0xff] }
  0x2a   :  { %v172_v1 = vmul.f32 1.442695, %v129_v56  ;;  %v139_v5 = vadd.f32 %v135_v50, %v72_v49  ;;  %v75_v6 = vmul.f32 0.5, %v63_v51  ;;  %v140_v10 = vadd.f32 %v136_v54, %v73_v53  ;;  %v98_v18 = vld [vmem:[#allocation5 + $0x30] sm:$0xff] }
  0x2b   :  { %252 = vpow2.f32 %v170_v55  ;;  %v65_v12 = vsub.f32 %v57_v60, %v47_v59  ;;  %v137_v14 = vmul.f32 %v90_v57, %v361_v44  ;;  %v76_v15 = vmul.f32 0.5, %v364_v58 }
  0x2c   :  { %254 = vpow2.f32 %v172_v1  ;;  %v101_v16 = vmul.f32 0.1, %v97_v0  ;;  %v74_v22 = vadd.f32 %v70_v62, %v43_v30  ;;  %v142_v23 = vmul.f32 %v100_v63, %v63_v51 }
  0x2d   :  { %v79_v26 = vadd.f32 %v75_v6, %v45_v38  ;;  %v77_v29 = vmul.f32 0.5, %v65_v12  ;;  %v102_v31 = vmul.f32 0.1, %v98_v18  ;;  %v80_v35 = vadd.f32 %v76_v15, %v46_v46 }
  0x2e   :  { %v241_v61 = vpop.eup %240  ;;  %v143_v36 = vmul.f32 %v101_v16, %v364_v58  ;;  %v141_v37 = vadd.f32 %v137_v14, %v74_v22 }
  0x2f   :  { %v243_v2 = vpop.eup %242  ;;  %v158_v4 = vmul.f32 %v241_v61, %v354_v11  ;;  %v66_v11 = vsub.f32 %v58_v8, %v48_v7  ;;  %v146_v41 = vadd.f32 %v142_v23, %v79_v26  ;;  %v81_v48 = vadd.f32 %v77_v29, %v47_v59 }
  0x30   :  { %v159_v9 = vmul.f32 %v243_v2, %v60_v17  ;;  %v99_v17 = vld [vmem:[#allocation5 + $0x38] sm:$0xff]  ;;  %v144_v49 = vmul.f32 %v102_v31, %v65_v12  ;;  %v147_v50 = vadd.f32 %v143_v36, %v80_v35 }
  0x31   :  { %v162_v13 = vmul.f32 0.5, %v158_v4  ;;  %v245_v19 = vpop.eup %244  ;;  %v103_v38 = vmul.f32 0.1, %v99_v17 }
  0x32   :  { %v163_v20 = vmul.f32 0.5, %v159_v9  ;;  %v160_v25 = vmul.f32 %v245_v19, %v356_v21  ;;  %v247_v33 = vpop.eup %246  ;;  %v78_v21 = vmul.f32 0.5, %v66_v11 }
  0x33   :  { %v182_v24 = vsub.f32 %v138_v3, %v162_v13  ;;  %v199_v27 = vadd.f32 %v162_v13, %v138_v3  ;;  %v249_v30 = vpop.eup %248  ;;  %v161_v39 = vmul.f32 %v247_v33, %v361_v44  ;;  %v145_v44 = vmul.f32 %v103_v38, %v66_v11 }
  0x34   :  { %v183_v28 = vsub.f32 %v139_v5, %v163_v20  ;;  %v200_v32 = vadd.f32 %v163_v20, %v139_v5  ;;  %v164_v34 = vmul.f32 0.5, %v160_v25  ;;  %v174_v42 = vmul.f32 %v249_v30, %v63_v51 }
  0x35   :  { %186 = vst [vmem:[#allocation7] sm:$0xff] %v182_v24  ;;  %204 = vst [vmem:[#allocation7 + $0x40] sm:$0xff] %v199_v27  ;;  %v251_v45 = vpop.eup %250  ;;  %v165_v47 = vmul.f32 0.5, %v161_v39  ;;  %v82_v54 = vadd.f32 %v78_v21, %v48_v7  ;;  %v148_v51 = vadd.f32 %v144_v49, %v81_v48 }
  0x36   :  { %187 = vst [vmem:[#allocation7 + $0x8] sm:$0xff] %v183_v28  ;;  %205 = vst [vmem:[#allocation7 + $0x48] sm:$0xff] %v200_v32  ;;  %v184_v40 = vsub.f32 %v140_v10, %v164_v34  ;;  %v201_v43 = vadd.f32 %v164_v34, %v140_v10  ;;  %v178_v46 = vmul.f32 0.5, %v174_v42  ;;  %v175_v52 = vmul.f32 %v251_v45, %v364_v58 }
  0x37   :  { %v185_v53 = vsub.f32 %v141_v37, %v165_v47  ;;  %v202_v55 = vadd.f32 %v165_v47, %v141_v37  ;;  %v149_v58 = vadd.f32 %v145_v44, %v82_v54 }
  0x38   :  { %188 = vst [vmem:[#allocation7 + $0x10] sm:$0xff] %v184_v40  ;;  %206 = vst [vmem:[#allocation7 + $0x50] sm:$0xff] %v201_v43  ;;  %v253_v56 = vpop.eup %252  ;;  %v190_v57 = vsub.f32 %v146_v41, %v178_v46  ;;  %v179_v60 = vmul.f32 0.5, %v175_v52  ;;  %v208_v61 = vadd.f32 %v178_v46, %v146_v41 }
  0x39   :  { %189 = vst [vmem:[#allocation7 + $0x18] sm:$0xff] %v185_v53  ;;  %v176_v62 = vmul.f32 %v253_v56, %v65_v12  ;;  %207 = vst [vmem:[#allocation7 + $0x58] sm:$0xff] %v202_v55  ;;  %v255_v59 = vpop.eup %254 }
  0x3a   :  { %195 = vst [vmem:[#allocation7 + $0x20] sm:$0xff] %v190_v57  ;;  %v191_v63 = vsub.f32 %v147_v50, %v179_v60  ;;  %213 = vst [vmem:[#allocation7 + $0x60] sm:$0xff] %v208_v61  ;;  %v209_v0 = vadd.f32 %v179_v60, %v147_v50  ;;  %v177_v2 = vmul.f32 %v255_v59, %v66_v11 }
  0x3b   :  { %v180_v1 = vmul.f32 0.5, %v176_v62 }
  0x3c   :  { %196 = vst [vmem:[#allocation7 + $0x28] sm:$0xff] %v191_v63  ;;  %214 = vst [vmem:[#allocation7 + $0x68] sm:$0xff] %v209_v0  ;;  %v181_v4 = vmul.f32 0.5, %v177_v2 }
  0x3d   :  { %v192_v3 = vsub.f32 %v148_v51, %v180_v1  ;;  %v210_v5 = vadd.f32 %v180_v1, %v148_v51 }
  0x3e   :  { %v193_v6 = vsub.f32 %v149_v58, %v181_v4  ;;  %v211_v7 = vadd.f32 %v181_v4, %v149_v58 }
  0x3f   :  { %197 = vst [vmem:[#allocation7 + $0x30] sm:$0xff] %v192_v3  ;;  %215 = vst [vmem:[#allocation7 + $0x70] sm:$0xff] %v210_v5 }
  0x40   :  { %198 = vst [vmem:[#allocation7 + $0x38] sm:$0xff] %v193_v6  ;;  %216 = vst [vmem:[#allocation7 + $0x78] sm:$0xff] %v211_v7 }
  0x41   :  { %307 = shalt.err (!%p304_p0)
}
  0x42   :  { %228 = dma.vmem_to_hbm [thread:$0]  %s223_s1, 2048, %s382_s2, [#allocation4], %s323_s12, %s323_s12, %s324_s13  }
  0x43   :  { %320 = dma.done.wait [#allocation4], 2048  }
  0x44   :  { %321 = vsyncadd [#allocation4], 4294965248 }
  0x45   :  { %232 = vsyncpa [#allocation3], 1 }
  0x46   :  { %233 = vsyncpa [#allocation6], 1 }
  0x47   :  { %234 = vsyncpa [#allocation4], 1 }

</bundles_post_ra>
